<compile_context>
chip_gen: v7x
topology: tpu7x:2x2x1
jax: 0.10.0
libtpu: 0.0.40
codegen_flags: <defaults>
</compile_context>

<pallas_src>
import math

import jax
import jax.numpy as jnp
from jax.experimental import pallas as pl
from jax.experimental.pallas import tpu as pltpu


def _round_up(x, m):
    return ((x + m - 1) // m) * m


def _make_kernel(H):
    def offset_scale_kernel(x_ref, g_ref, b_ref, *o_refs):
        # x_ref  : (TN, kD)  current row-tile of (lane-folded) x
        # g_ref  : (H, kD)   gamma, resident in VMEM
        # b_ref  : (H, kD)   beta, resident in VMEM
        # o_refs : H refs of (TN, kD), one per head
        x = x_ref[...]                              # read x once, reuse for all heads
        for h in range(H):                          # static unroll over heads
            g = g_ref[pl.ds(h, 1), :]               # (1, kD)
            b = b_ref[pl.ds(h, 1), :]               # (1, kD)
            o_refs[h][...] = (x * g + b).astype(o_refs[h].dtype)
    return offset_scale_kernel


def offset_scale(x, gamma, beta, *, max_row_tile=4096):
    """x: (..., D); gamma/beta: (H, D). Returns tuple of H arrays shaped like x."""
    orig_shape = x.shape
    D = orig_shape[-1]
    H, Dg = gamma.shape
    assert Dg == D

    N = 1
    for s in orig_shape[:-1]:
        N *= s
    x2d = x.reshape(N, D)

    # Keep compute dtype == x dtype (matches the PyTorch module where params
    # and activations share a dtype).
    gamma = gamma.astype(x.dtype)
    beta = beta.astype(x.dtype)

    # ---- Lane folding (only when it needs no padding) ----------------------
    if D % 128 != 0:
        k = 128 // math.gcd(D, 128)
        if k > 16 or N % k != 0:
            k = 1  # folding would need a pad (extra HBM pass) -> skip it
    else:
        k = 1
    kD = k * D
    n_rows = N // k

    xf = x2d.reshape(n_rows, kD)                     # row-major reshape: free
    gk = jnp.tile(gamma, (1, k)) if k > 1 else gamma  # (H, kD)
    bk = jnp.tile(beta, (1, k)) if k > 1 else beta    # (H, kD)

    itemsize = jnp.dtype(x.dtype).itemsize
    sub = max(8, 32 // itemsize)                     # min sublane tile

    # ---- Row-tile selection -------------------------------------------------
    # Budget for the double-buffered x tile + H double-buffered output tiles.
    vmem_budget = 12 * 1024 * 1024                   # safe on v5e/v6e/v7x
    bytes_per_row = kD * itemsize
    cap = vmem_budget // (2 * (1 + H) * bytes_per_row)
    cap = max(sub, (cap // sub) * sub)

    if n_rows <= sub:
        row_tile = n_rows                            # single (full-dim) tile
    else:
        row_tile = min(max_row_tile, cap, _round_up(n_rows, sub))
        row_tile = max(sub, (row_tile // sub) * sub)
        # Ensure >= 2 grid steps so both v7x TensorCores get work.
        while row_tile > sub and pl.cdiv(n_rows, row_tile) < 2:
            row_tile = max(sub, ((row_tile // 2) // sub) * sub)

    grid = (pl.cdiv(n_rows, row_tile),)

    # ---- VMEM limit sized to the actual footprint (+ headroom) -------------
    footprint = (2 * (1 + H) * row_tile * kD + 4 * H * kD) * itemsize
    vmem_limit = int(min(48 << 20, max(16 << 20, footprint + (2 << 20))))

    # ---- Cost estimate: pure HBM streaming, (1+H) passes --------------------
    cost = pl.CostEstimate(
        flops=2 * H * N * D,
        transcendentals=0,
        bytes_accessed=(1 + H) * N * D * itemsize + 2 * H * D * itemsize,
    )

    out_shapes = tuple(
        jax.ShapeDtypeStruct((n_rows, kD), x.dtype) for _ in range(H)
    )
    out_specs = tuple(
        pl.BlockSpec((row_tile, kD), lambda i: (i, 0)) for _ in range(H)
    )

    outs = pl.pallas_call(
        _make_kernel(H),
        out_shape=out_shapes,
        grid_spec=pltpu.PrefetchScalarGridSpec(
            num_scalar_prefetch=0,
            grid=grid,
            in_specs=[
                pl.BlockSpec((row_tile, kD), lambda i: (i, 0)),  # x row tile
                pl.BlockSpec((H, kD), lambda i: (0, 0)),         # gamma (resident)
                pl.BlockSpec((H, kD), lambda i: (0, 0)),         # beta  (resident)
            ],
            out_specs=out_specs,
        ),
        compiler_params=pltpu.CompilerParams(
            dimension_semantics=("parallel",),
            vmem_limit_bytes=vmem_limit,
        ),
        cost_estimate=cost,
    )(xf, gk, bk)

    if not isinstance(outs, (tuple, list)):
        outs = (outs,)

    # No padding was introduced: n_rows * kD == N * D exactly.
    results = []
    for o in outs:
        results.append(o.reshape(N, D).reshape(orig_shape))
    return tuple(results)


if __name__ == "__main__":
    B, S, D, H = 2, 8, 32, 2

    key = jax.random.PRNGKey(0)
    kx, kg = jax.random.split(key)

    x = jax.random.normal(kx, (B, S, D), dtype=jnp.float32)
    # Matches nn.init.normal_(gamma, std=0.02), beta = zeros.
    gamma = 0.02 * jax.random.normal(kg, (H, D), dtype=jnp.float32)
    beta = jnp.zeros((H, D), dtype=jnp.float32)

    outs = offset_scale(x, gamma, beta)
    outs = jax.block_until_ready(outs)

    # Pure-JAX reference check of semantics.
    ref = x[..., None, :] * gamma + beta          # (B, S, H, D)
    for h in range(H):
        assert jnp.allclose(outs[h], ref[..., h, :], atol=1e-6, rtol=1e-6)

    # Also exercise a non-divisible / no-fold edge case (N % k != 0).
    x_odd = jax.random.normal(kx, (3, 5, D), dtype=jnp.float32)
    outs_odd = jax.block_until_ready(offset_scale(x_odd, gamma, beta))
    ref_odd = x_odd[..., None, :] * gamma + beta
    for h in range(H):
        assert jnp.allclose(outs_odd[h], ref_odd[..., h, :], atol=1e-6, rtol=1e-6)

    print("KERNEL_OK")
</pallas_src>

<mosaic_0001>
module attributes {stable_mosaic.version = 11 : i64} {
  func.func @offset_scale_kernel(%arg0: i32, %arg1: memref<4x128xf32, #tpu.memory_space<vmem>>, %arg2: memref<2x128xf32, #tpu.memory_space<vmem>>, %arg3: memref<2x128xf32, #tpu.memory_space<vmem>>, %arg4: memref<4x128xf32, #tpu.memory_space<vmem>>, %arg5: memref<4x128xf32, #tpu.memory_space<vmem>>) attributes {dimension_semantics = [#tpu.dimension_semantics<parallel>], iteration_bounds = array<i64: 1>, scalar_prefetch = 0 : i64, scratch_operands = 0 : i64, tpu.core_type = #tpu.core_type<tc>, window_params = [{transform_indices = @transform_0, window_bounds = array<i64: 4, 128>}, {pipeline_mode = #tpu.pipeline_mode<synchronous>, transform_indices = @transform_1, window_bounds = array<i64: 2, 128>}, {pipeline_mode = #tpu.pipeline_mode<synchronous>, transform_indices = @transform_2, window_bounds = array<i64: 2, 128>}, {transform_indices = @transform_3, window_bounds = array<i64: 4, 128>}, {transform_indices = @transform_4, window_bounds = array<i64: 4, 128>}]} {
    %c0 = arith.constant 0 : index
    %c0_0 = arith.constant 0 : index
    %0 = vector.load %arg1[%c0, %c0_0] : memref<4x128xf32, #tpu.memory_space<vmem>>, vector<4x128xf32>
    %c0_1 = arith.constant 0 : index
    %c0_2 = arith.constant 0 : index
    %1 = vector.load %arg2[%c0_1, %c0_2] : memref<2x128xf32, #tpu.memory_space<vmem>>, vector<1x128xf32>
    %c0_3 = arith.constant 0 : index
    %c0_4 = arith.constant 0 : index
    %2 = vector.load %arg3[%c0_3, %c0_4] : memref<2x128xf32, #tpu.memory_space<vmem>>, vector<1x128xf32>
    %3 = vector.broadcast %1 : vector<1x128xf32> to vector<4x128xf32>
    %4 = arith.mulf %0, %3 : vector<4x128xf32>
    %5 = vector.broadcast %2 : vector<1x128xf32> to vector<4x128xf32>
    %6 = arith.addf %4, %5 : vector<4x128xf32>
    %c0_5 = arith.constant 0 : index
    %c0_6 = arith.constant 0 : index
    %7 = vector.load %arg4[%c0_5, %c0_6] : memref<4x128xf32, #tpu.memory_space<vmem>>, vector<4x128xf32>
    tpu.vector_store %arg4[%c0_5, %c0_6], %6 {strides = array<i32>} : memref<4x128xf32, #tpu.memory_space<vmem>>, vector<4x128xf32>,
    %c1 = arith.constant 1 : index
    %c0_7 = arith.constant 0 : index
    %8 = vector.load %arg2[%c1, %c0_7] : memref<2x128xf32, #tpu.memory_space<vmem>>, vector<1x128xf32>
    %c1_8 = arith.constant 1 : index
    %c0_9 = arith.constant 0 : index
    %9 = vector.load %arg3[%c1_8, %c0_9] : memref<2x128xf32, #tpu.memory_space<vmem>>, vector<1x128xf32>
    %10 = vector.broadcast %8 : vector<1x128xf32> to vector<4x128xf32>
    %11 = arith.mulf %0, %10 : vector<4x128xf32>
    %12 = vector.broadcast %9 : vector<1x128xf32> to vector<4x128xf32>
    %13 = arith.addf %11, %12 : vector<4x128xf32>
    %c0_10 = arith.constant 0 : index
    %c0_11 = arith.constant 0 : index
    %14 = vector.load %arg5[%c0_10, %c0_11] : memref<4x128xf32, #tpu.memory_space<vmem>>, vector<4x128xf32>
    tpu.vector_store %arg5[%c0_10, %c0_11], %13 {strides = array<i32>} : memref<4x128xf32, #tpu.memory_space<vmem>>, vector<4x128xf32>,
    return
  }
  func.func @transform_0(%arg0: i32) -> (i32, i32) {
    %c0_i32 = arith.constant 0 : i32
    %c0_i32_0 = arith.constant 0 : i32
    return %arg0, %c0_i32 : i32, i32
  }
  func.func @transform_1(%arg0: i32) -> (i32, i32) {
    %c0_i32 = arith.constant 0 : i32
    %c0_i32_0 = arith.constant 0 : i32
    %c0_i32_1 = arith.constant 0 : i32
    return %c0_i32, %c0_i32_0 : i32, i32
  }
  func.func @transform_2(%arg0: i32) -> (i32, i32) {
    %c0_i32 = arith.constant 0 : i32
    %c0_i32_0 = arith.constant 0 : i32
    %c0_i32_1 = arith.constant 0 : i32
    return %c0_i32, %c0_i32_0 : i32, i32
  }
  func.func @transform_3(%arg0: i32) -> (i32, i32) {
    %c0_i32 = arith.constant 0 : i32
    %c0_i32_0 = arith.constant 0 : i32
    return %arg0, %c0_i32 : i32, i32
  }
  func.func @transform_4(%arg0: i32) -> (i32, i32) {
    %c0_i32 = arith.constant 0 : i32
    %c0_i32_0 = arith.constant 0 : i32
    return %arg0, %c0_i32 : i32, i32
  }
}

</mosaic_0001>

<bundles_post_ra>
// kernel: tpu_custom_call.1
= control target key start
LH: loop header
LB: loop body
LE: loop exit
PB: predicated region body
PF: predicated region fallthrough
CT: control target
= control target key end

     0   :  { %10 = vsyncpa [#allocation3], 0  ;;  %s241_s0 = inlined_call_operand.hbm [shape: f32[4,128], index: 0, kind: input, shape index: {}]   ;;  %s242_s1 = inlined_call_operand.vmem [shape: f32[2,128], index: 1, kind: input, shape index: {}]   ;;  %s243_s2 = inlined_call_operand.vmem [shape: f32[2,128], index: 2, kind: input, shape index: {}]   ;;  %s244_s3 = inlined_call_operand.hbm [shape: f32[4,128], index: 3, kind: output, shape index: {0}]   ;;  %s245_s4 = inlined_call_operand.hbm [shape: f32[4,128], index: 4, kind: output, shape index: {1}]  }
   0x1   :  { %11 = vsyncpa [#allocation4], 0 }
   0x2   :  { %12 = vsyncpa [#allocation7], 0  ;;  %s165_s15 = smov [#allocation2]   ;;  %s93_s19 = scalar_lea.hbm %s241_s0, 64 }
   0x3   :  { %s19_s16 = sshll.u32 %s165_s15, 4  ;;  %p94_p0 = scmp.ne.s32.totalorder %s241_s0, %s93_s19  ;;  %s20_s16 = int_to_ptr.vmem [resolvable:$true] %s19_s16 }
   0x4   :  { %p97_p1 = scmp.lt.u32.totalorder %s93_s19, %s241_s0 }
   0x6   :  { %p99_p2 = pnand %p97_p1, %p94_p0 }
   0x8   :  { %102 = shalt.err (!%p99_p2)
}
   0x9   :  { %s103_s24 = scalar_lea.vmem %s20_s16, 64  ;;  %p108_p4 = scmp.lt.s32.totalorder %s20_s16, %s20_s16 }
   0xa   :  { %p104_p3 = scmp.ne.s32.totalorder %s20_s16, %s103_s24  ;;  %p109_p5 = scmp.lt.s32.totalorder %s103_s24, %s103_s24 }
   0xc   :  { %p110_p6 = por %p109_p5, %p108_p4 }
   0xe   :  { %p111_p7 = pnand %p110_p6, %p104_p3 }
  0x10   :  { %114 = shalt.err (!%p111_p7)
}
  0x11   :  { %22 = dma.hbm_to_vmem [thread:$0]  %s241_s0, 64, %s20_s16, [#allocation3]  }
  0x12   :  { %159 = dma.done.wait [#allocation3], 64  }
  0x13   :  { %160 = vsyncadd [#allocation3], 4294967232  ;;  %s166_s27 = smov [#allocation5]   ;;  %v30_v0 = vld [vmem:[#allocation2] sm:$0xf]  ;;  %s167_s10 = smov [#allocation6]  }
  0x14   :  { %s63_s28 = sshll.u32 %s166_s27, 4  ;;  %v86_v1 = vld [vmem:[%s242_s1] ss:$0 sm:$0xff]  ;;  %v88_v4 = vld [vmem:[%s242_s1 + $0x1] ss:$0 sm:$0xff]  ;;  %s73_s11 = sshll.u32 %s167_s10, 4  ;;  %s64_s28 = int_to_ptr.vmem [resolvable:$true] %s63_s28  ;;  %s74_s11 = int_to_ptr.vmem [resolvable:$true] %s73_s11 }
  0x15   :  { %v87_v2 = vld [vmem:[%s243_s2] ss:$0 sm:$0xff]  ;;  %v37_v3 = vmul.f32 %v86_v1, %v30_v0  ;;  %v89_v5 = vld [vmem:[%s243_s2 + $0x1] ss:$0 sm:$0xff]  ;;  %v50_v6 = vmul.f32 %v88_v4, %v30_v0  ;;  %s115_s12 = scalar_lea.vmem %s64_s28, 64  ;;  %p120_p9 = scmp.lt.s32.totalorder %s64_s28, %s64_s28 }
  0x16   :  { %p116_p8 = scmp.ne.s32.totalorder %s64_s28, %s115_s12  ;;  %p121_p10 = scmp.lt.s32.totalorder %s115_s12, %s115_s12 }
  0x17   :  { %v42_v7 = vadd.f32 %v87_v2, %v37_v3  ;;  %v55_v8 = vadd.f32 %v89_v5, %v50_v6 }
  0x18   :  { %p122_p11 = por %p121_p10, %p120_p9 }
  0x19   :  { %43 = vst [vmem:[#allocation5] sm:$0xf] %v42_v7  ;;  %56 = vst [vmem:[#allocation6] sm:$0xf] %v55_v8 }
  0x1a   :  { %p123_p12 = pnand %p122_p11, %p116_p8 }
  0x1c   :  { %126 = shalt.err (!%p123_p12)
}
  0x1d   :  { %s127_s2 = scalar_lea.hbm %s244_s3, 64 }
  0x1e   :  { %p128_p13 = scmp.ne.s32.totalorder %s244_s3, %s127_s2  ;;  %p131_p0 = scmp.lt.u32.totalorder %s127_s2, %s244_s3 }
  0x20   :  { %p133_p1 = pnand %p131_p0, %p128_p13 }
  0x22   :  { %136 = shalt.err (!%p133_p1)
}
  0x23   :  { %66 = dma.vmem_to_hbm [thread:$0]  %s64_s28, 64, %s244_s3, [#allocation4]  }
  0x24   :  { %s137_s20 = scalar_lea.vmem %s74_s11, 64  ;;  %p142_p3 = scmp.lt.s32.totalorder %s74_s11, %s74_s11 }
  0x25   :  { %p138_p2 = scmp.ne.s32.totalorder %s74_s11, %s137_s20  ;;  %p143_p4 = scmp.lt.s32.totalorder %s137_s20, %s137_s20 }
  0x27   :  { %p144_p5 = por %p143_p4, %p142_p3 }
  0x29   :  { %p145_p6 = pnand %p144_p5, %p138_p2 }
  0x2b   :  { %148 = shalt.err (!%p145_p6)
}
  0x2c   :  { %s149_s23 = scalar_lea.hbm %s245_s4, 64 }
  0x2d   :  { %p150_p7 = scmp.ne.s32.totalorder %s245_s4, %s149_s23  ;;  %p153_p8 = scmp.lt.u32.totalorder %s149_s23, %s245_s4 }
  0x2f   :  { %p155_p9 = pnand %p153_p8, %p150_p7 }
  0x31   :  { %158 = shalt.err (!%p155_p9)
}
  0x32   :  { %76 = dma.vmem_to_hbm [thread:$0]  %s74_s11, 64, %s245_s4, [#allocation7]  }
  0x33   :  { %161 = dma.done.wait [#allocation4], 64  }
  0x34   :  { %162 = vsyncadd [#allocation4], 4294967232 }
  0x35   :  { %163 = dma.done.wait [#allocation7], 64  }
  0x36   :  { %164 = vsyncadd [#allocation7], 4294967232 }
  0x37   :  { %83 = vsyncpa [#allocation3], 1 }
  0x38   :  { %84 = vsyncpa [#allocation4], 1 }
  0x39   :  { %85 = vsyncpa [#allocation7], 1 }

</bundles_post_ra>
